<compile_context>
chip_gen: v7x
topology: tpu7x:2x2x1
jax: 0.10.0
libtpu: 0.0.40
codegen_flags: <defaults>
</compile_context>

<pallas_src>
import functools

import jax
import jax.numpy as jnp
import numpy as np
from jax import lax
from jax.experimental import pallas as pl
from jax.experimental.pallas import tpu as pltpu


def cesar_kernel(emb_ref, rside_ref, cside_ref, mw_ref, o_ref, *, mm_dtype):
    # Single MXU-dtype cast of the streamed embeddings; reused by BOTH matmuls.
    emm = emb_ref[...].astype(mm_dtype)                         # (Bblk, S, H)

    rside = rside_ref[...]                                      # (Bblk, S, 2) f32
    cside = cside_ref[...]                                      # (Bblk, 2, S) f32
    radd = rside[:, :, 0:1]     # sentence-1 row bias; -1e30 where row invalid
    rrow = rside[:, :, 1:2]     # 1 / ||e_i||
    cadd = cside[:, 0:1, :]     # sentence-2 col bias; -1e30 where col invalid
    rcol = cside[:, 1:2, :]     # 1 / ||e_j||

    # |cosine| score: Gram of raw embeddings post-scaled by inverse norms
    # (no normalised S x H copy).  Last-dim contraction on both operands ->
    # no XLU transpose of the S x H tile.
    gram = lax.dot_general(emm, emm, (((2,), (2,)), ((0,), (0,))),
                           preferred_element_type=jnp.float32)  # (Bblk, S, S)
    score = jnp.abs(gram) * rrow * rcol

    # Attention logits via the fused bilinear form E (Wq^T Wk) E^T; the
    # i-only / j-only bias terms arrive through radd / cadd and the constant
    # bq.bk is dropped (softmax shift-invariance).
    pm = lax.dot_general(emm, mw_ref[...], (((2,), (0,)), ((), ())),
                         preferred_element_type=jnp.float32)    # (Bblk, S, H)
    logits = lax.dot_general(pm.astype(mm_dtype), emm,
                             (((2,), (2,)), ((0,), (0,))),
                             preferred_element_type=jnp.float32)  # (Bblk, S, S)

    masked = logits + radd + cadd   # invalid rows/cols pushed to ~ -1e30

    # Flattened (global) masked softmax folded into the weighted mean:
    #   cs = sum(exp(masked - max) * score) / sum(exp(masked - max))
    mx = jnp.max(jnp.max(masked, axis=2, keepdims=True), axis=1, keepdims=True)
    ex = jnp.exp(masked - mx)       # invalid entries underflow to exactly 0
    num = jnp.sum(jnp.sum(ex * score, axis=2, keepdims=True),
                  axis=1, keepdims=True)                        # (Bblk, 1, 1)
    den = jnp.sum(jnp.sum(ex, axis=2, keepdims=True),
                  axis=1, keepdims=True)                        # (Bblk, 1, 1)
    cs = num / jnp.maximum(den, jnp.float32(1e-30))   # den >= 1 (max attained)

    o_ref[...] = jnp.broadcast_to(cs, o_ref.shape).astype(o_ref.dtype)


def cesar_pallas(embeddings, attention_masks, token_type_ids, wq, bq, wk, bk,
                 *, block_b=None, use_bf16=True):
    """CESAR forward (post-encoder).

    embeddings: [B,S,H] last_hidden_state (f32 or bf16; DMA'd in native dtype);
    attention_masks / token_type_ids: [B,S] int; wq/wk: [H,H]; bq/bk: [H].
    use_bf16=False is a VALIDATION-ONLY mode (multi-pass MXU on v5e).
    Returns cs: [B] float32.
    """
    B, S, H = embeddings.shape
    LANE = 128
    mm_dtype = jnp.bfloat16 if use_bf16 else jnp.float32

    emb_f32 = embeddings.astype(jnp.float32)
    tok = attention_masks == 1
    valid1 = tok & (token_type_ids == 0)                        # sentence 1 (rows)
    valid2 = tok & (token_type_ids == 1)                        # sentence 2 (cols)

    # Fused bilinear weights:
    #   q_i . k_j = e_i^T (Wq^T Wk) e_j + e_i^T (Wq^T bk) + (Wk^T bq)^T e_j + bq.bk
    # The constant term is dropped (softmax shift-invariant).
    wq32, bq32 = wq.astype(jnp.float32), bq.astype(jnp.float32)
    wk32, bk32 = wk.astype(jnp.float32), bk.astype(jnp.float32)
    mw = (wq32.T @ wk32).astype(mm_dtype)                       # (H, H)
    row_bias = emb_f32 @ (wq32.T @ bk32)                        # (B, S)
    col_bias = emb_f32 @ (wk32.T @ bq32)                        # (B, S)

    neg = jnp.float32(-1e30)
    inv_norm = lax.rsqrt(jnp.maximum(jnp.sum(emb_f32 * emb_f32, axis=-1),
                                     jnp.float32(1e-24)))       # (B, S)
    # Pack (bias+mask, inverse-norm) per orientation so only one lane-padded
    # (S, 128) sidecar is streamed per example.
    row_side = jnp.stack([jnp.where(valid1, row_bias, neg), inv_norm], axis=-1)  # (B,S,2)
    col_side = jnp.stack([jnp.where(valid2, col_bias, neg), inv_norm], axis=1)   # (B,2,S)

    # ---- block_b heuristic: MXU fill, >=2 grid steps, VMEM budget ----------
    emb_itm = jnp.dtype(embeddings.dtype).itemsize
    mm_itm = jnp.dtype(mm_dtype).itemsize
    Sp = -(-S // 8) * 8
    Sl = -(-S // LANE) * LANE
    Hl = -(-H // LANE) * LANE

    def vmem_est(bb):
        stream = bb * (Sp * Hl * emb_itm        # embeddings block
                       + Sp * LANE * 4          # row_side (lane-padded)
                       + 8 * Sl * 4             # col_side (sublane-padded)
                       + 8 * LANE * 4)          # output slab
        temps = bb * (4 * Sp * Sl * 4           # gram / score / logits / ex
                      + Sp * Hl * (4 + mm_itm))  # pm (f32) + emm (mm dtype)
        weights = Hl * Hl * mm_itm
        return 2 * stream + 2 * weights + temps

    vmem_cap = 64 * 2 ** 20                     # conservative default (v7x per-TC)
    try:
        vmem_cap = int(getattr(pltpu.get_tpu_info(), "vmem_capacity_bytes",
                               vmem_cap)) or vmem_cap
    except Exception:
        pass
    budget = min(int(0.75 * vmem_cap), 100 * 2 ** 20)

    if block_b is None:
        bb = max(1, 512 // max(S, 1))           # target ~512 rows per MXU pass
        bb = min(bb, B)
        if B > 1:
            bb = min(bb, -(-B // 2))            # >=2 grid steps (v7x megacore)
        while bb > 1 and vmem_est(bb) > budget:
            bb -= 1
        block_b = bb

    n_blk = -(-B // block_b)
    Bp = n_blk * block_b
    if Bp != B:
        pad = ((0, Bp - B), (0, 0), (0, 0))
        embeddings = jnp.pad(embeddings, pad)
        row_side = jnp.pad(row_side, pad)       # zero-padded examples stay finite
        col_side = jnp.pad(col_side, pad)

    vmem_limit = int(min(max(vmem_est(block_b) + (4 << 20), 16 << 20), budget))

    out = pl.pallas_call(
        functools.partial(cesar_kernel, mm_dtype=mm_dtype),
        out_shape=jax.ShapeDtypeStruct((Bp, 1, LANE), jnp.float32),
        grid_spec=pltpu.PrefetchScalarGridSpec(
            num_scalar_prefetch=0,
            grid=(n_blk,),
            in_specs=[
                pl.BlockSpec((block_b, S, H), lambda b: (b, 0, 0)),  # embeddings
                pl.BlockSpec((block_b, S, 2), lambda b: (b, 0, 0)),  # row bias+mask | 1/||e||
                pl.BlockSpec((block_b, 2, S), lambda b: (b, 0, 0)),  # col bias+mask | 1/||e||
                pl.BlockSpec((H, H), lambda b: (0, 0)),              # Wq^T Wk (grid-invariant)
            ],
            out_specs=pl.BlockSpec((block_b, 1, LANE), lambda b: (b, 0, 0)),
        ),
        compiler_params=pltpu.CompilerParams(
            dimension_semantics=("parallel",),
            vmem_limit_bytes=vmem_limit,
        ),
    )(embeddings, row_side, col_side, mw)

    cs = out[:B, 0, 0]
    # Guard examples with zero valid (sentence-1 x sentence-2) pairs; this guard
    # is coupled to the -1e30 sentinel used above (do not remove one without the other).
    n1 = jnp.sum(valid1, axis=1)
    n2 = jnp.sum(valid2, axis=1)
    return jnp.where((n1 > 0) & (n2 > 0), cs, jnp.float32(0.0))


def cesar_reference(embeddings, attention_masks, token_type_ids, wq, bq, wk, bk):
    """Pure NumPy re-implementation of the PyTorch forward (post-encoder)."""
    embeddings = np.asarray(embeddings, np.float32)
    att = np.asarray(attention_masks)
    tt = np.asarray(token_type_ids)
    wq, bq, wk, bk = (np.asarray(a, np.float32) for a in (wq, bq, wk, bk))
    cs = []
    for e, a, t in zip(embeddings, att, tt):
        tok = a == 1
        e1 = e[np.logical_and(tok, t == 0)]
        e2 = e[np.logical_and(tok, t == 1)]
        e1n = e1 / np.maximum(np.linalg.norm(e1, axis=1, keepdims=True), 1e-12)
        e2n = e2 / np.maximum(np.linalg.norm(e2, axis=1, keepdims=True), 1e-12)
        score = np.abs(e1n @ e2n.T)
        q = e1 @ wq.T + bq
        k = e2 @ wk.T + bk
        logits = q @ k.T
        flat = logits.reshape(-1)
        flat = np.exp(flat - flat.max())
        attn = (flat / flat.sum()).reshape(logits.shape)
        cs.append(np.sum(attn * score))
    return np.stack(cs)


if __name__ == "__main__":
    B, S, H, V = 4, 8, 32, 50
    key = jax.random.PRNGKey(0)
    k_ids, k_word, k_type, k_pos, k_wq, k_bq, k_wk, k_bk = jax.random.split(key, 8)

    input_ids = jax.random.randint(k_ids, (B, S), 0, V, dtype=jnp.int32)
    token_type_ids = jnp.concatenate(
        [jnp.zeros((B, S // 2), jnp.int32), jnp.ones((B, S - S // 2), jnp.int32)], axis=1
    )
    attention_masks = (jnp.ones((B, S), jnp.int32)
                       .at[1, -1].set(0)        # one padded token
                       .at[3, -2:].set(0))      # two padded tokens

    # TODO(synk): BertModel.from_pretrained has no in-script Pallas equivalent;
    # deterministic embedding-sum stand-in producing last_hidden_state [B,S,H].
    word_emb = jax.random.normal(k_word, (V, H), jnp.float32) * 0.5
    type_emb = jax.random.normal(k_type, (2, H), jnp.float32) * 0.1
    pos_emb = jax.random.normal(k_pos, (S, H), jnp.float32) * 0.1
    embeddings = word_emb[input_ids] + type_emb[token_type_ids] + pos_emb[None]

    # Deterministic q / k Linear(H, H) parameters.
    wq = jax.random.normal(k_wq, (H, H), jnp.float32) / np.sqrt(H)
    bq = jax.random.normal(k_bq, (H,), jnp.float32) * 0.01
    wk = jax.random.normal(k_wk, (H, H), jnp.float32) / np.sqrt(H)
    bk = jax.random.normal(k_bk, (H,), jnp.float32) * 0.01

    cs_ref = cesar_reference(embeddings, attention_masks, token_type_ids, wq, bq, wk, bk)

    # f32 MXU path: tight check of the fused bilinear formulation (default
    # heuristic -> block_b=2, grid=(2,), no padding).
    cs_f32 = jax.block_until_ready(
        cesar_pallas(embeddings, attention_masks, token_type_ids, wq, bq, wk, bk,
                     use_bf16=False))
    np.testing.assert_allclose(np.asarray(cs_f32), cs_ref, rtol=1e-3, atol=1e-5)

    # Production path: bf16 encoder output DMA'd natively, bf16 MXU operands,
    # block_b=3 forces a padded multi-block grid (Bp=6, grid=(2,)).
    cs_bf16 = jax.block_until_ready(
        cesar_pallas(embeddings.astype(jnp.bfloat16), attention_masks,
                     token_type_ids, wq, bq, wk, bk, block_b=3, use_bf16=True))
    np.testing.assert_allclose(np.asarray(cs_bf16), cs_ref, rtol=5e-2, atol=5e-3)

    print("KERNEL_OK")
</pallas_src>

<mosaic_0001>
module attributes {stable_mosaic.version = 11 : i64} {
  func.func @cesar_kernel(%arg0: i32, %arg1: memref<2x8x32xf32, #tpu.memory_space<vmem>>, %arg2: memref<2x8x2xf32, #tpu.memory_space<vmem>>, %arg3: memref<2x2x8xf32, #tpu.memory_space<vmem>>, %arg4: memref<32x32xf32, #tpu.memory_space<vmem>>, %arg5: memref<2x1x128xf32, #tpu.memory_space<vmem>>) attributes {dimension_semantics = [#tpu.dimension_semantics<parallel>], iteration_bounds = array<i64: 2>, scalar_prefetch = 0 : i64, scratch_operands = 0 : i64, tpu.core_type = #tpu.core_type<tc>, window_params = [{transform_indices = @transform_0, window_bounds = array<i64: 2, 8, 32>}, {transform_indices = @transform_1, window_bounds = array<i64: 2, 8, 2>}, {transform_indices = @transform_2, window_bounds = array<i64: 2, 2, 8>}, {pipeline_mode = #tpu.pipeline_mode<synchronous>, transform_indices = @transform_3, window_bounds = array<i64: 32, 32>}, {transform_indices = @transform_4, window_bounds = array<i64: 2, 1, 128>}]} {
    %c0 = arith.constant 0 : index
    %c0_0 = arith.constant 0 : index
    %c0_1 = arith.constant 0 : index
    %0 = vector.load %arg1[%c0, %c0_0, %c0_1] : memref<2x8x32xf32, #tpu.memory_space<vmem>>, vector<2x8x32xf32>
    %c0_2 = arith.constant 0 : index
    %c0_3 = arith.constant 0 : index
    %c0_4 = arith.constant 0 : index
    %1 = vector.load %arg2[%c0_2, %c0_3, %c0_4] : memref<2x8x2xf32, #tpu.memory_space<vmem>>, vector<2x8x2xf32>
    %c0_5 = arith.constant 0 : index
    %c0_6 = arith.constant 0 : index
    %c0_7 = arith.constant 0 : index
    %2 = vector.load %arg3[%c0_5, %c0_6, %c0_7] : memref<2x2x8xf32, #tpu.memory_space<vmem>>, vector<2x2x8xf32>
    %3 = vector.extract_strided_slice %1 {offsets = [0, 0, 0], sizes = [2, 8, 1], strides = [1, 1, 1]} : vector<2x8x2xf32> to vector<2x8x1xf32>
    %4 = vector.extract_strided_slice %1 {offsets = [0, 0, 1], sizes = [2, 8, 1], strides = [1, 1, 1]} : vector<2x8x2xf32> to vector<2x8x1xf32>
    %5 = vector.extract_strided_slice %2 {offsets = [0, 0, 0], sizes = [2, 1, 8], strides = [1, 1, 1]} : vector<2x2x8xf32> to vector<2x1x8xf32>
    %6 = vector.extract_strided_slice %2 {offsets = [0, 1, 0], sizes = [2, 1, 8], strides = [1, 1, 1]} : vector<2x2x8xf32> to vector<2x1x8xf32>
    %cst = arith.constant dense<0.000000e+00> : vector<2x8x8xf32>
    %7 = tpu.matmul %0, %0, %cst {dimension_numbers = #tpu.dot_dimension_numbers<[2], [2], [1], [1], [0, 0, 0, 1, 1, 1], [0], [0]>} : vector<2x8x32xf32>, vector<2x8x32xf32>, vector<2x8x8xf32> -> vector<2x8x8xf32>
    %8 = math.absf %7 : vector<2x8x8xf32>
    %9 = vector.broadcast %4 : vector<2x8x1xf32> to vector<2x8x8xf32>
    %10 = arith.mulf %8, %9 : vector<2x8x8xf32>
    %11 = vector.broadcast %6 : vector<2x1x8xf32> to vector<2x8x8xf32>
    %12 = arith.mulf %10, %11 : vector<2x8x8xf32>
    %c0_8 = arith.constant 0 : index
    %c0_9 = arith.constant 0 : index
    %13 = vector.load %arg4[%c0_8, %c0_9] : memref<32x32xf32, #tpu.memory_space<vmem>>, vector<32x32xf32>
    %cst_10 = arith.constant dense<0.000000e+00> : vector<2x8x32xf32>
    %14 = tpu.matmul %0, %13, %cst_10 {dimension_numbers = #tpu.dot_dimension_numbers<[2], [0], [0, 1], [1], [0, 0, 0, 1, 1, 1], [], []>} : vector<2x8x32xf32>, vector<32x32xf32>, vector<2x8x32xf32> -> vector<2x8x32xf32>
    %cst_11 = arith.constant dense<0.000000e+00> : vector<2x8x8xf32>
    %15 = tpu.matmul %14, %0, %cst_11 {dimension_numbers = #tpu.dot_dimension_numbers<[2], [2], [1], [1], [0, 0, 0, 1, 1, 1], [0], [0]>} : vector<2x8x32xf32>, vector<2x8x32xf32>, vector<2x8x8xf32> -> vector<2x8x8xf32>
    %16 = vector.broadcast %3 : vector<2x8x1xf32> to vector<2x8x8xf32>
    %17 = arith.addf %15, %16 : vector<2x8x8xf32>
    %18 = vector.broadcast %5 : vector<2x1x8xf32> to vector<2x8x8xf32>
    %19 = arith.addf %17, %18 : vector<2x8x8xf32>
    %cst_12 = arith.constant dense<0xFF800000> : vector<2x8xf32>
    %20 = vector.multi_reduction <maximumf>, %19, %cst_12 [2] : vector<2x8x8xf32> to vector<2x8xf32>
    %21 = vector.shape_cast %20 : vector<2x8xf32> to vector<2x8x1xf32>
    %cst_13 = arith.constant dense<0xFF800000> : vector<2x1xf32>
    %22 = vector.multi_reduction <maximumf>, %21, %cst_13 [1] : vector<2x8x1xf32> to vector<2x1xf32>
    %23 = vector.shape_cast %22 : vector<2x1xf32> to vector<2x1x1xf32>
    %24 = vector.broadcast %23 : vector<2x1x1xf32> to vector<2x8x8xf32>
    %25 = arith.subf %19, %24 : vector<2x8x8xf32>
    %26 = math.exp %25 : vector<2x8x8xf32>
    %27 = arith.mulf %26, %12 : vector<2x8x8xf32>
    %cst_14 = arith.constant dense<0.000000e+00> : vector<2x8xf32>
    %28 = vector.multi_reduction <add>, %27, %cst_14 [2] : vector<2x8x8xf32> to vector<2x8xf32>
    %29 = vector.shape_cast %28 : vector<2x8xf32> to vector<2x8x1xf32>
    %cst_15 = arith.constant dense<0.000000e+00> : vector<2x1xf32>
    %30 = vector.multi_reduction <add>, %29, %cst_15 [1] : vector<2x8x1xf32> to vector<2x1xf32>
    %31 = vector.shape_cast %30 : vector<2x1xf32> to vector<2x1x1xf32>
    %cst_16 = arith.constant dense<0.000000e+00> : vector<2x8xf32>
    %32 = vector.multi_reduction <add>, %26, %cst_16 [2] : vector<2x8x8xf32> to vector<2x8xf32>
    %33 = vector.shape_cast %32 : vector<2x8xf32> to vector<2x8x1xf32>
    %cst_17 = arith.constant dense<0.000000e+00> : vector<2x1xf32>
    %34 = vector.multi_reduction <add>, %33, %cst_17 [1] : vector<2x8x1xf32> to vector<2x1xf32>
    %35 = vector.shape_cast %34 : vector<2x1xf32> to vector<2x1x1xf32>
    %cst_18 = arith.constant 1.000000e-30 : f32
    %36 = vector.broadcast %cst_18 : f32 to vector<2x1x1xf32>
    %37 = arith.maximumf %35, %36 : vector<2x1x1xf32>
    %38 = arith.divf %31, %37 : vector<2x1x1xf32>
    %39 = vector.shape_cast %38 : vector<2x1x1xf32> to vector<2x1x1xf32>
    %40 = vector.broadcast %39 : vector<2x1x1xf32> to vector<2x1x128xf32>
    %c0_19 = arith.constant 0 : index
    %c0_20 = arith.constant 0 : index
    %c0_21 = arith.constant 0 : index
    %41 = vector.load %arg5[%c0_19, %c0_20, %c0_21] : memref<2x1x128xf32, #tpu.memory_space<vmem>>, vector<2x1x128xf32>
    tpu.vector_store %arg5[%c0_19, %c0_20, %c0_21], %40 {strides = array<i32>} : memref<2x1x128xf32, #tpu.memory_space<vmem>>, vector<2x1x128xf32>,
    return
  }
  func.func @transform_0(%arg0: i32) -> (i32, i32, i32) {
    %c0_i32 = arith.constant 0 : i32
    %c0_i32_0 = arith.constant 0 : i32
    %c0_i32_1 = arith.constant 0 : i32
    return %arg0, %c0_i32, %c0_i32_0 : i32, i32, i32
  }
  func.func @transform_1(%arg0: i32) -> (i32, i32, i32) {
    %c0_i32 = arith.constant 0 : i32
    %c0_i32_0 = arith.constant 0 : i32
    %c0_i32_1 = arith.constant 0 : i32
    return %arg0, %c0_i32, %c0_i32_0 : i32, i32, i32
  }
  func.func @transform_2(%arg0: i32) -> (i32, i32, i32) {
    %c0_i32 = arith.constant 0 : i32
    %c0_i32_0 = arith.constant 0 : i32
    %c0_i32_1 = arith.constant 0 : i32
    return %arg0, %c0_i32, %c0_i32_0 : i32, i32, i32
  }
  func.func @transform_3(%arg0: i32) -> (i32, i32) {
    %c0_i32 = arith.constant 0 : i32
    %c0_i32_0 = arith.constant 0 : i32
    %c0_i32_1 = arith.constant 0 : i32
    return %c0_i32, %c0_i32_0 : i32, i32
  }
  func.func @transform_4(%arg0: i32) -> (i32, i32, i32) {
    %c0_i32 = arith.constant 0 : i32
    %c0_i32_0 = arith.constant 0 : i32
    %c0_i32_1 = arith.constant 0 : i32
    return %arg0, %c0_i32, %c0_i32_0 : i32, i32, i32
  }
}

</mosaic_0001>

<bundles_post_ra>
// kernel: tpu_custom_call.1
= control target key start
LH: loop header
LB: loop body
LE: loop exit
PB: predicated region body
PF: predicated region fallthrough
CT: control target
= control target key end

     0   :  { %9 = vsyncpa [#allocation3], 0  ;;  %s1314_s0 = inlined_call_operand.vmem [shape: f32[4,8,32], index: 0, kind: input, shape index: {}]   ;;  %s1315_s1 = inlined_call_operand.vmem [shape: f32[4,8,2], index: 1, kind: input, shape index: {}]   ;;  %s1316_s2 = inlined_call_operand.vmem [shape: f32[4,2,8], index: 2, kind: input, shape index: {}]   ;;  %s1317_s3 = inlined_call_operand.hbm [shape: f32[32,32], index: 3, kind: input, shape index: {}]   ;;  %s1318_s4 = inlined_call_operand.hbm [shape: f32[4,1,128], index: 4, kind: output, shape index: {}]  }
   0x1   :  { %10 = vsyncpa [#allocation4], 0 }
   0x2   :  { %12 = vsyncpa [#allocation4 + $0x1], 0  ;;  %s1144_s15 = smov 0   ;;  %s1146_s16 = smov 0  }
   0x3   :  { %s1148_s17 = smov 0   ;;  %s1150_s18 = smov 0  }
   0x4 LB: > { %s1165_s19 = sadd.s32 4294967295, %s1107_s18   ;;  %s861_s20 = sadd.s32 4294967294, %s1107_s18   ;;  %s1107_s18 = sphi %s1150_s18, %s1334_s18   ;;  %s1103_s17 = sphi %s1148_s17, %s1333_s17   ;;  %s1099_s16 = sphi %s1146_s16, %s1332_s16   ;;  %s1095_s15 = sphi %s1144_s15, %s1331_s15  }
   0x5   : > { %s1169_s21 = sadd.s32 1, %s1107_s18   ;;  %s124_s22 = sadd.s32 1, %s1103_s17 }
   0x6   : > { %s121_s23 = ssub.s32 %s1107_s18, %s1169_s21  ;;  %p134_p0 = scmp.ne.s32.totalorder %s1103_s17, %s1099_s16 }
   0x7   : > { %p122_p1 = scmp.eq.s32.totalorder %s121_s23, 0  ;;  %p135_p2 = scmp.eq.s32.totalorder %s1165_s19, 1 }
   0x8   : > { %p140_p3 = scmp.ne.s32.totalorder %s1099_s16, %s1095_s15  ;;  %p141_p4 = scmp.eq.s32.totalorder %s861_s20, 1 }
   0x9   : > { %s1180_s24 = scalar_select %p122_p1, %s1103_s17, %s124_s22  }
   0xa   : > { %p1182_p5 = por %p135_p2, %p134_p0  ;;  %p1186_p6 = por %p141_p4, %p140_p3 }
   0xb   : > { %p862_p7 = scmp.ge.s32.totalorder %s1107_s18, 1  ;;  %p148_p8 = scmp.lt.s32.totalorder %s1107_s18, 3 }
   0xc   : > { %s1322_s25 = scalar_select %p1182_p5, 1, 0 }
   0xd   : > { %s1323_s26 = scalar_select %p1186_p6, 1, 0 }
   0xe   : > { %p1319_p9 = scmp.eq.s32.totalorder %s1165_s19, 0  ;;  %p1193_p10 = pnand %p862_p7, %p148_p8 }
   0xf   : > { %s1109_s28 = smov [#allocation2]   ;;  %s1013_s7 = scalar_lea.hbm %s1317_s3, 512 }
  0x10   : > { %s1324_s27 = scalar_select %p1193_p10, 1, 0 }
  0x11   : > { %s160_s29 = sshll.u32 %s1109_s28, 4  ;;  %p949_p11 = pneg %p1193_p10  ;;  %s161_s29 = int_to_ptr.vmem [resolvable:$true] %s160_s29 }
  0x12   : > { %p1014_p13 = scmp.ne.s32.totalorder %s1317_s3, %s1013_s7  ;;  %p1020_p3 = scmp.lt.u32.totalorder %s1013_s7, %s1317_s3 }
  0x13   : > { %p1201_p12 = pnand %p1319_p9, %p949_p11 }
  0x15   : > { %p1015_p0 = pneg %p1201_p12 }
  0x17   : > { %p1016_p1 = pnand %p1015_p0, %p1014_p13 }
  0x19   : > { %p1017_p2 = pneg %p1016_p1 }
  0x1b   : > { %p1022_p4 = pnand %p1020_p3, %p1017_p2 }
  0x1d   : > { %1025 = shalt.err (!%p1022_p4)
}
  0x1e   : > { %s1026_s12 = scalar_lea.vmem %s161_s29, 512  ;;  %p1034_p9 = scmp.lt.s32.totalorder %s161_s29, %s161_s29 }
  0x1f   : > { %p1027_p7 = scmp.ne.s32.totalorder %s161_s29, %s1026_s12  ;;  %p1035_p6 = scmp.lt.s32.totalorder %s1026_s12, %s1026_s12 }
  0x21   : > { %p1029_p8 = pnand %p1027_p7, %p1015_p0  ;;  %p1036_p5 = por %p1035_p6, %p1034_p9 }
  0x23   : > { %p1030_p11 = pneg %p1029_p8 }
  0x25   : > { %p1037_p10 = pnand %p1036_p5, %p1030_p11 }
  0x27   : > { %1040 = shalt.err (!%p1037_p10)
}
  0x28   : > { %s1110_s13 = smov 128   ;;  %s1111_s14 = smov 8  }
  0x29   : > { %952 = dma.hbm_to_vmem [thread:$0]  (!%p1201_p12), %s1317_s3, 512, %s161_s29, [#allocation3], %s1110_s13, %s1110_s13, %s1111_s14  }
  0x2a   : > { %p1326_p13 = scmp.ne.s32.totalorder %s1324_s27, 0 }
  0x2b   : > { %p1327_p1 = scmp.eq.s32.totalorder (!%p1326_p13), %s1165_s19, 0 }
  0x2c   : > { %203 = sbr.rel (%p1326_p13) target bundleno = 858 (0x35a), region = 36 }
  0x33   : > { %1086 = dma.done.wait (%p1327_p1), [#allocation3], 512   ;;  %p1328_p0 = pmov %p1327_p1 }
  0x34   : > { %s868_s23 = sshll.u32 %s1165_s19, 1  ;;  %v1112_v0 = vmov 0.0   ;;  %vm1113_vm0 = vmmov 0   ;;  %v1114_v1 = vmov 0   ;;  %v1115_v2 = vmov 1   ;;  %v435_v5 = vld [vmem:[#allocation2] sm:$0xff] }
  0x35   : > { %1088 = vsyncadd (%p1328_p0), [#allocation3], 4294966784  ;;  %904 = vmatprep.subr.mxu0 %v1112_v0  ;;  %p240_p5 = scmp.lt.s32.totalorder %s868_s23, 3  ;;  %906 = vmatprep.mubr.msk.f32.mxu0 %vm1113_vm0, %v1112_v0  ;;  %vm264_vm1 = vcmask 261120   ;;  %v436_v6 = vld [vmem:[#allocation2 + $0x8] sm:$0xff]  ;;  %v437_v7 = vld [vmem:[#allocation2 + $0x10] sm:$0xff]  ;;  %v425_v19 = vlaneseq }
  0x36   : > { %1001 = vset.pattern.permute.xlu0 %v1114_v1  ;;  %909 = vmatprep.subr.mxu1 %v1112_v0  ;;  %v438_v8 = vld [vmem:[#allocation2 + $0x18] sm:$0xff]  ;;  %v935_v9 = vpack.c.bf16 %v436_v6, %v435_v5  ;;  %vm678_vm2 = vcmask 64512   ;;  %s236_s12 = sand.u32 1, %s1099_s16   ;;  %s889_s14 = sshll.u32 %s1165_s19, 5 }
  0x37   : > { %s1336_s23 = smov (!%p240_p5, %s868_s23), 3  ;;  %911 = vmatprep.mubr.msk.f32.mxu1 %vm1113_vm0, %v1112_v0  ;;  %1003 = vset.pattern.permute.xlu1 %v1115_v2  ;;  %v939_v10 = vpack.c.bf16 %v438_v8, %v437_v7  ;;  %v426_v20 = vshrl.u32 %v425_v19, 7  ;;  %s867_s13 = sshll.u32 %s236_s12, 1 }
  0x38   : > { %s869_s27 = sshll.u32 %s1336_s23, 3  ;;  %s873_s8 = sshll.u32 %s1336_s23, 1 }
  0x39   : > { %s243_s30 = scalar_lea.vmem %s1314_s0, %s869_s27  ;;  %s249_s7 = scalar_lea.vmem %s1315_s1, %s869_s27  ;;  %v670_v21 = vsub.s32 0, %v426_v20  ;;  %v427_v56 = vsub.s32 1, %v426_v20 }
  0x3a   : > { %v258_v3 = vld [vmem:[%s243_s30] sm:$0xff]  ;;  %v259_v4 = vld [vmem:[%s243_s30 + $0x8] sm:$0xff]  ;;  %s255_s11 = scalar_lea.vmem %s1316_s2, %s873_s8  ;;  %s238_s20 = scalar_lea.vmem [#allocation5], %s867_s13 }
  0x3b   : > { %905 = vmatpush3.xpose.msk.msra.mxu0 %vm264_vm1, %v258_v3  ;;  %910 = vmatpush3.xpose.msk.msra.mxu1 %vm264_vm1, %v259_v4  ;;  %v260_v11 = vld [vmem:[%s249_s7] sm:$0xff]  ;;  %v261_v12 = vld [vmem:[%s249_s7 + $0x8] sm:$0xff]  ;;  %s763_s22 = sshll.u32 %s238_s20, 4  ;;  %s1269_s28 = scalar_lea.hbm %s1318_s4, %s889_s14  ;;  %s1271_s22 = int_to_ptr.vmem [resolvable:$true] %s763_s22 }
  0x3c   : > { %925 = vmatprep.subr.mxu1 %v1112_v0  ;;  %515 = vperm.xlu0 %1001, %v260_v11   ;;  %v262_v23 = vld [vmem:[%s255_s11] sm:$0x3]  ;;  %v263_v26 = vld [vmem:[%s255_s11 + $0x2] sm:$0x3]  ;;  %s1273_s29 = scalar_lea.sflag [#allocation4], %s236_s12  ;;  %s1041_s19 = scalar_lea.vmem %s1271_s22, 32 }
  0x3d   : > { %936 = vmatprep.subr.bf16.mxu0 %v935_v9  ;;  %v671_v24 = vrot.slane %v262_v23, %v670_v21  ;;  %v675_v30 = vrot.slane %v263_v26, %v670_v21  ;;  %v428_v59 = vrot.slane %v262_v23, %v427_v56  ;;  %p1042_p6 = scmp.ne.s32.totalorder %s1271_s22, %s1041_s19  ;;  %p1329_p9 = scmp.ne.s32.totalorder %s1322_s25, 0 }
  0x3e   : > { %907 = vmatmul.mubr.msk.f32.vlgmr.msra.gmra.mrb[0].mxu0 %vm264_vm1, %v258_v3  ;;  %912 = vmatmul.mubr.msk.f32.vlgmr.msra.gmra.mrb[0].mxu1 %vm264_vm1, %v259_v4  ;;  %s1116_s30 = smov [#allocation5]  }
  0x3f   : > { %938 = vmatpush3.bf16.msra.mxu0 %v935_v9  ;;  %922 = vmatprep.mubr.msk.f32.mxu0 %vm264_vm1, %v258_v3  ;;  %p1043_p10 = pnand %p1042_p6, %p1329_p9  ;;  %s1045_s5 = sshll.u32 %s1116_s30, 4  ;;  %s1046_s5 = int_to_ptr.vmem [resolvable:$false] %s1045_s5 }
  0x40   : > { %940 = vmatprep.subr.bf16.mxu0 %v939_v10  ;;  %519 = vperm.xlu0 %1001, %v261_v12   ;;  %s1047_s6 = scalar_lea.vmem %s1046_s5, 64  ;;  %p1048_p2 = scmp.lt.s32.totalorder %s1271_s22, %s1046_s5 }
  0x41   : > { %926 = vmatpush3.xpose.msk.msra.mxu1 %vm264_vm1, %v258_v3  ;;  %927 = vmatprep.mubr.msk.f32.mxu1 %vm1113_vm0, %v1112_v0  ;;  %p1044_p12 = pneg %p1043_p10  ;;  %p1049_p3 = scmp.lt.s32.totalorder %s1047_s6, %s1041_s19 }
  0x42   : > { %930 = vmatprep.subr.mxu1 %v1112_v0 }
  0x43   : > { %942 = vmatpush3.bf16.msra.mxu0 %v939_v10  ;;  %p1050_p4 = por %p1049_p3, %p1048_p2 }
  0x44   : > { %1002 = vset.pattern.permute.xlu0 %v1115_v2 }
  0x45   : > { %415 = vperm.xlu0 %1002, %v260_v11   ;;  %p1051_p7 = pnand %p1050_p4, %p1044_p12 }
  0x46   : > { %923 = vmatmul.mubr.msk.f32.vlgmr.msra.gmra.mrb[2].mxu0 %vm264_vm1, %v259_v4 }
  0x49   : > { %1004 = vset.pattern.permute.xlu0 %v1114_v1 }
  0xbb   : > { %v516_v22 = vpop.permute.xlu0 %515 }
  0xbf   : > { %v520_v31 = vpop.permute.xlu0 %519 }
  0xc4   : > { %v416_v57 = vpop.permute.xlu0 %415 }
 0x111   : > { %v334_v13 = vpop.f32.mrb[0].mxu0  ;;  %v1247_v15 = vpop.f32.mrb[0].mxu1 }
 0x112   : > { %v908_v14 = vpop.f32.mrb[1].mxu0  ;;  %v913_v16 = vpop.f32.mrb[1].mxu1  ;;  %v411_v55 = vand.u32 2147483647, %v334_v13  ;;  %v412_v62 = vand.u32 2147483647, %v1247_v15 }
 0x114   : > { %v423_v60 = vmul.f32 %v416_v57, %v411_v55 }
 0x116   : > { %v433_v63 = vmul.f32 %v428_v59, %v423_v60 }
 0x119   : > { %v924_v17 = vpop.f32.mrb[2].mxu0 }
 0x11a   : > { %v505_v18 = vpop.f32.mrb[3].mxu0 }
 0x11b   : > { %928 = vmatmul.mubr.msk.f32.vlgmr.msra.gmra.mrb[2].mxu1 %vm264_vm1, %v505_v18 }
 0x11c   : > { %931 = vmatpush3.xpose.msk.msra.mxu1 %vm264_vm1, %v259_v4  ;;  %932 = vmatprep.mubr.msk.f32.mxu1 %vm1113_vm0, %v1112_v0  ;;  %v432_v0 = vrot.slane %v263_v26, %v427_v56 }
 0x11f   : > { %933 = vmatmul.mubr.msk.f32.vlgmr.msra.gmra.mrb[4].mxu1 %vm264_vm1, %v924_v17 }
 0x1ee   : > { %v591_v25 = vpop.f32.mrb[2].mxu1 }
 0x1ef   : > { %v592_v27 = vadd.f32 %v591_v25, %v516_v22  ;;  %v929_v28 = vpop.f32.mrb[3].mxu1 }
 0x1f1   : > { %v676_v29 = vadd.f32 %v671_v24, %v592_v27 }
 0x1f2   : > { %v664_v32 = vpop.f32.mrb[4].mxu1 }
 0x1f3   : > { %v665_v33 = vadd.f32 %v664_v32, %v520_v31  ;;  %v934_v34 = vpop.f32.mrb[5].mxu1  ;;  %v679_v35 = vsel %vm678_vm2, %v676_v29, -inf }
 0x1f4   : > { %680 = vmax.xlane.f32.xlu1 %v679_v35 }
 0x1f5   : > { %v677_v36 = vadd.f32 %v675_v30, %v665_v33 }
 0x1f7   : > { %v682_v37 = vsel %vm678_vm2, %v677_v36, -inf }
 0x1f8   : > { %683 = vmax.xlane.f32.xlu1 %v682_v37 }
 0x209   : > { %420 = vperm.xlu1 %1003, %v261_v12  }
 0x281   : > { %v681_v38 = vpop.xlane.xlu1 %680 }
 0x282   : > { %v685_v39 = vrot.slane %v681_v38, 4 }
 0x284   : > { %v686_v40 = vmax.f32 %v681_v38, %v685_v39 }
 0x285   : > { %v684_v41 = vpop.xlane.xlu1 %683 }
 0x286   : > { %v687_v42 = vrot.slane %v686_v40, 2  ;;  %v691_v43 = vrot.slane %v684_v41, 4 }
 0x288   : > { %v688_v44 = vmax.f32 %v686_v40, %v687_v42  ;;  %v692_v45 = vmax.f32 %v684_v41, %v691_v43 }
 0x289   : > { %v421_v61 = vpop.permute.xlu1 %420 }
 0x28a   : > { %v689_v46 = vrot.slane %v688_v44, 1  ;;  %v693_v47 = vrot.slane %v692_v45, 2  ;;  %v424_v1 = vmul.f32 %v421_v61, %v412_v62 }
 0x28c   : > { %v690_v48 = vmax.f32 %v688_v44, %v689_v46  ;;  %v694_v49 = vmax.f32 %v692_v45, %v693_v47  ;;  %v434_v5 = vmul.f32 %v432_v0, %v424_v1 }
 0x28e   : > { %v697_v50 = vsub.f32 %v676_v29, %v690_v48  ;;  %v695_v51 = vrot.slane %v694_v49, 1 }
 0x290   : > { %v699_v52 = vmul.f32 1.442695, %v697_v50  ;;  %v696_v53 = vmax.f32 %v694_v49, %v695_v51 }
 0x292   : > { %1005 = vpow2.f32 %v699_v52  ;;  %v698_v54 = vsub.f32 %v677_v36, %v696_v53 }
 0x294   : > { %v701_v58 = vmul.f32 1.442695, %v698_v54 }
 0x296   : > { %1007 = vpow2.f32 %v701_v58 }
 0x29c   : > { %v1006_v2 = vpop.eup %1005 }
 0x29d   : > { %v723_v3 = vsel %vm678_vm2, %v1006_v2, 0.0  ;;  %v703_v4 = vmul.f32 %v1006_v2, %v433_v63 }
 0x29e   : > { %724 = vadd.xlane.f32.xlu0 %v723_v3 }
 0x29f   : > { %v705_v7 = vsel %vm678_vm2, %v703_v4, 0.0 }
 0x2a0   : > { %v1008_v6 = vpop.eup %1007 }
 0x2a1   : > { %v726_v8 = vsel %vm678_vm2, %v1008_v6, 0.0  ;;  %v704_v9 = vmul.f32 %v1008_v6, %v434_v5 }
 0x2a2   : > { %706 = vadd.xlane.f32.xlu0 %v705_v7  ;;  %727 = vadd.xlane.f32.xlu1 %v726_v8 }
 0x2a3   : > { %v708_v10 = vsel %vm678_vm2, %v704_v9, 0.0 }
 0x2a6   : > { %709 = vadd.xlane.f32.xlu0 %v708_v10 }
 0x32b   : > { %v725_v11 = vpop.xlane.xlu0 %724 }
 0x32c   : > { %v729_v12 = vrot.slane %v725_v11, 4 }
 0x32e   : > { %v730_v13 = vadd.f32 %v729_v12, %v725_v11 }
 0x32f   : > { %v707_v14 = vpop.xlane.xlu0 %706  ;;  %v728_v15 = vpop.xlane.xlu1 %727 }
 0x330   : > { %v731_v16 = vrot.slane %v730_v13, 2  ;;  %v711_v17 = vrot.slane %v707_v14, 4  ;;  %v735_v18 = vrot.slane %v728_v15, 4 }
 0x332   : > { %v732_v19 = vadd.f32 %v731_v16, %v730_v13  ;;  %v736_v20 = vadd.f32 %v735_v18, %v728_v15  ;;  %v712_v21 = vadd.f32 %v711_v17, %v707_v14 }
 0x333   : > { %v710_v22 = vpop.xlane.xlu0 %709 }
 0x334   : > { %v733_v23 = vrot.slane %v732_v19, 1  ;;  %v737_v24 = vrot.slane %v736_v20, 2  ;;  %v717_v25 = vrot.slane %v710_v22, 4  ;;  %v713_v28 = vrot.slane %v712_v21, 2 }
 0x336   : > { %v734_v26 = vadd.f32 %v733_v23, %v732_v19  ;;  %v738_v27 = vadd.f32 %v737_v24, %v736_v20  ;;  %v718_v29 = vadd.f32 %v717_v25, %v710_v22  ;;  %v714_v33 = vadd.f32 %v713_v28, %v712_v21 }
 0x338   : > { %v741_v30 = vmax.f32 %v734_v26, 1e-30  ;;  %v739_v31 = vrot.slane %v738_v27, 1  ;;  %v719_v34 = vrot.slane %v718_v29, 2  ;;  %v715_v36 = vrot.slane %v714_v33, 1 }
 0x33a   : > { %1009 = vrcp.f32 %v741_v30  ;;  %v740_v32 = vadd.f32 %v739_v31, %v738_v27  ;;  %v720_v37 = vadd.f32 %v719_v34, %v718_v29  ;;  %v716_v38 = vadd.f32 %v715_v36, %v714_v33 }
 0x33c   : > { %v742_v35 = vmax.f32 %v740_v32, 1e-30  ;;  %v721_v39 = vrot.slane %v720_v37, 1 }
 0x33e   : > { %1011 = vrcp.f32 %v742_v35  ;;  %v722_v42 = vadd.f32 %v721_v39, %v720_v37 }
 0x344   : > { %v1010_v40 = vpop.eup %1009 }
 0x345   : > { %v744_v41 = vmul.f32 %v1010_v40, %v716_v38 }
 0x347   : > { %747 = vst [vmem:[%s238_s20] sm:$0x1] %v744_v41 }
 0x348   : > { %v1012_v43 = vpop.eup %1011 }
 0x349   : > { %v746_v44 = vmul.f32 %v1012_v43, %v722_v42 }
 0x34b   : > { %748 = vst [vmem:[%s238_s20 + $0x1] sm:$0x1] %v746_v44 }
 0x34c   : > { %1054 = shalt.err (!%p1051_p7)
}
 0x34d   : > { %s1055_s7 = scalar_lea.hbm %s1269_s28, 32  ;;  %s1059_s10 = scalar_lea.hbm %s1318_s4, 64 }
 0x34e   : > { %p1056_p8 = scmp.ne.s32.totalorder %s1269_s28, %s1055_s7  ;;  %p1060_p1 = scmp.lt.u32.totalorder %s1269_s28, %s1318_s4 }
 0x34f   : > { %p1061_p0 = scmp.lt.u32.totalorder %s1059_s10, %s1055_s7  ;;  %p1063_p6 = scmp.lt.u32.totalorder %s1055_s7, %s1269_s28 }
 0x350   : > { %p1057_p11 = pnand %p1056_p8, %p1329_p9 }
 0x351   : > { %p1062_p5 = por %p1061_p0, %p1060_p1 }
 0x352   : > { %p1058_p13 = pneg %p1057_p11 }
 0x353   : > { %p1064_p10 = por %p1063_p6, %p1062_p5 }
 0x355   : > { %p1065_p12 = pnand %p1064_p10, %p1058_p13 }
 0x357   : > { %1068 = shalt.err (!%p1065_p12)
}
 0x358   : > { %s1117_s13 = smov 16   ;;  %s1118_s14 = smov 1  }
 0x359   : > { %947 = dma.vmem_to_hbm [thread:$0]  (%p1329_p9), %s1271_s22, 32, %s1269_s28, %s1273_s29, %s1117_s13, %s1117_s13, %s1118_s14  }
 0x35a PF: > { %p959_p2 = scmp.ge.s32.totalorder %s1107_s18, 2  ;;  %s778_s20 = sand.u32 1, %s1095_s15  }
 0x35b   : > { %p1330_p3 = scmp.ne.s32.totalorder %s1323_s26, 0  ;;  %s779_s23 = scalar_lea.sflag [#allocation4], %s778_s20 }
 0x35d   : > { %p954_p4 = pnand %p959_p2, %p1330_p3 }
 0x35f   : > { %1090 = dma.done.wait (!%p954_p4), %s779_s23, 32  }
 0x360   : > { %1092 = vsyncadd (!%p954_p4), %s779_s23, 4294967264  ;;  %p15_p7 = scmp.ge.s32.totalorder %s1169_s21, 4   ;;  %s1331_s15 = smov %s1099_s16 }
 0x361   : > { %s1332_s16 = smov %s1103_s17  ;;  %s1333_s17 = smov %s1180_s24 }
 0x362   : > { %s1334_s18 = smov %s1169_s21  ;;  %17 = sbr.rel (!%p15_p7) target bundleno = 4 (0x4), region = 82 }
 0x369   :  { %784 = vsyncpa [#allocation3], 1 }
 0x36a   :  { %786 = vsyncpa [#allocation3 + $0x1], 1 }
 0x36b   :  { %787 = vsyncpa [#allocation4], 1 }
 0x36c   :  { %789 = vsyncpa [#allocation4 + $0x1], 1 }

</bundles_post_ra>
